<compile_context>
chip_gen: v7x
topology: tpu7x:2x2x1
jax: 0.10.0
libtpu: 0.0.40
codegen_flags: <defaults>
</compile_context>

<pallas_src>
import jax
import jax.numpy as jnp
from jax.experimental import pallas as pl
from jax.experimental.pallas import tpu as pltpu


# ------------------------------- kernels ------------------------------------


def _finalize_losses(margin_ref, accp_ref, accn_ref, o_ref, use_softplus):
    d_pos = jnp.sqrt(accp_ref[...])
    d_neg = jnp.sqrt(accn_ref[...])
    diff = d_pos - d_neg
    if use_softplus:
        # Matches nn.Softplus(beta=1, threshold=1): linear once beta*x > threshold.
        # Note: SoftplusTripletLoss does NOT add the margin (matches the module).
        loss = jnp.where(diff > 1.0, diff,
                         jnp.log1p(jnp.exp(jnp.minimum(diff, 1.0))))
    else:
        loss = jnp.maximum(diff + margin_ref[0], 0.0)
    o_ref[...] = loss


def _make_split_kernel(use_softplus):
    """Fast path: dense per-role (BT, BLOCK_D) refs (requires D % BLOCK_D == 0)."""

    def kernel(margin_ref, a_ref, p_ref, n_ref, o_ref, accp_ref, accn_ref):
        k = pl.program_id(1)
        nk = pl.num_programs(1)

        @pl.when(k == 0)
        def _init():
            accp_ref[...] = jnp.zeros_like(accp_ref)
            accn_ref[...] = jnp.zeros_like(accn_ref)

        a = a_ref[...].astype(jnp.float32)          # anchor loaded once, reused
        dp = a - p_ref[...].astype(jnp.float32)
        dn = a - n_ref[...].astype(jnp.float32)
        accp_ref[...] += jnp.sum(dp * dp, axis=-1, keepdims=True)
        accn_ref[...] += jnp.sum(dn * dn, axis=-1, keepdims=True)

        @pl.when(k == nk - 1)
        def _fin():
            _finalize_losses(margin_ref, accp_ref, accn_ref, o_ref, use_softplus)

    return kernel


def _make_packed_kernel(D, block_d, use_softplus):
    """General path: (BT, 3, BLOCK_D) block, roles sliced in-kernel, tail masked."""
    mask_tail = (D % block_d) != 0

    def kernel(margin_ref, x_ref, o_ref, accp_ref, accn_ref):
        k = pl.program_id(1)
        nk = pl.num_programs(1)

        @pl.when(k == 0)
        def _init():
            accp_ref[...] = jnp.zeros_like(accp_ref)
            accn_ref[...] = jnp.zeros_like(accn_ref)

        a = x_ref[:, 0, :].astype(jnp.float32)
        p = x_ref[:, 1, :].astype(jnp.float32)
        n = x_ref[:, 2, :].astype(jnp.float32)
        dp = a - p
        dn = a - n

        if mask_tail:
            # Only the final feature chunk pays for the iota/compare/select.
            @pl.when(k < nk - 1)
            def _body():
                accp_ref[...] += jnp.sum(dp * dp, axis=-1, keepdims=True)
                accn_ref[...] += jnp.sum(dn * dn, axis=-1, keepdims=True)

            @pl.when(k == nk - 1)
            def _tail():
                lane = jax.lax.broadcasted_iota(jnp.int32, dp.shape, 1)
                valid = (k * block_d + lane) < D
                dpm = jnp.where(valid, dp, 0.0)
                dnm = jnp.where(valid, dn, 0.0)
                accp_ref[...] += jnp.sum(dpm * dpm, axis=-1, keepdims=True)
                accn_ref[...] += jnp.sum(dnm * dnm, axis=-1, keepdims=True)
        else:
            accp_ref[...] += jnp.sum(dp * dp, axis=-1, keepdims=True)
            accn_ref[...] += jnp.sum(dn * dn, axis=-1, keepdims=True)

        @pl.when(k == nk - 1)
        def _fin():
            _finalize_losses(margin_ref, accp_ref, accn_ref, o_ref, use_softplus)

    return kernel


# ------------------------------- wrapper -------------------------------------


def _round_up(x, m):
    return ((x + m - 1) // m) * m


def mean_triplet_batch_triplet_loss(batch: jax.Array,
                                    margin: float = 1.0,
                                    use_softplus: bool = False,
                                    block_d: int = 16384,
                                    target_input_vmem_bytes: int = 3 << 20
                                    ) -> jax.Array:
    """Pallas implementation of MeanTripletBatchTripletLoss.forward.

    batch: (B, 3, *embedding_dims) -- batch[:, 0]=anchor, [:, 1]=positive,
    [:, 2]=negative.
    """
    if batch.ndim < 2 or batch.shape[1] != 3:
        raise ValueError("expected batch of shape (B, 3, *embedding_dims)")
    assert block_d % 128 == 0, "block_d must be a multiple of 128"

    B = int(batch.shape[0])
    D = 1
    for s in batch.shape[2:]:
        D *= int(s)
    itemsize = jnp.dtype(batch.dtype).itemsize
    x3 = batch.reshape(B, 3, D)  # free reshape, no extra HBM traffic

    # ---- feature chunk (lane-dense, multiple of 128 or full D) ----
    fast = (D % 128 == 0)
    if fast:
        if D <= block_d:
            BLOCK_D = D
        else:
            # largest multiple-of-128 divisor of D that is <= block_d
            m = D // 128
            d_best = 1
            for c in range(block_d // 128, 0, -1):
                if m % c == 0:
                    d_best = c
                    break
            BLOCK_D = 128 * d_best
    else:
        BLOCK_D = D if D <= block_d else block_d
    nk = pl.cdiv(D, BLOCK_D)

    # ---- triplet block: size so per-step input VMEM ~= target (per buffer).
    # Fast path has 3 dense role buffers; packed path pads the role axis 3->8.
    per_row_bytes = (3 if fast else 8) * BLOCK_D * itemsize
    bt = max(8, target_input_vmem_bytes // per_row_bytes)
    bt = max(8, (bt // 8) * 8)
    if B <= 8:
        BT = B
    else:
        cap = _round_up(B, 8)
        if B >= 16:
            # keep >=2 blocks along the parallel axis so v7x's 2 TCs both stream
            cap = min(cap, _round_up(pl.cdiv(B, 2), 8))
        BT = min(bt, cap)
    nbb = pl.cdiv(B, BT)
    b_pad = nbb * BT

    margin_arr = jnp.full((1,), margin, dtype=jnp.float32)
    cost = pl.CostEstimate(
        flops=6 * B * D,                 # 2 diffs x (sub + mul + add) per element
        transcendentals=2 * B,
        bytes_accessed=3 * B * D * itemsize + b_pad * 4 + 4,
    )

    out_shape = jax.ShapeDtypeStruct((b_pad, 1), jnp.float32)
    out_spec = pl.BlockSpec((BT, 1), lambda bb, k: (bb, 0))
    scratch = [pltpu.VMEM((BT, 1), jnp.float32),   # sum((a-p)^2) per triplet
               pltpu.VMEM((BT, 1), jnp.float32)]   # sum((a-n)^2) per triplet
    cparams = pltpu.CompilerParams(
        dimension_semantics=("parallel", "arbitrary"))
    margin_spec = pl.BlockSpec(memory_space=pltpu.MemorySpace.SMEM)

    if fast:
        # Flatten roles into the feature axis: row b = [anchor_b | pos_b | neg_b].
        x2 = x3.reshape(B, 3 * D)
        nkr = D // BLOCK_D  # feature blocks per role

        def role_spec(r):
            return pl.BlockSpec((BT, BLOCK_D),
                                lambda bb, k, r=r: (bb, r * nkr + k))

        losses = pl.pallas_call(
            _make_split_kernel(use_softplus),
            grid=(nbb, nk),
            in_specs=[margin_spec, role_spec(0), role_spec(1), role_spec(2)],
            out_specs=out_spec,
            out_shape=out_shape,
            scratch_shapes=scratch,
            compiler_params=cparams,
            cost_estimate=cost,
        )(margin_arr, x2, x2, x2)
    else:
        losses = pl.pallas_call(
            _make_packed_kernel(D, BLOCK_D, use_softplus),
            grid=(nbb, nk),
            in_specs=[margin_spec,
                      pl.BlockSpec((BT, 3, BLOCK_D), lambda bb, k: (bb, 0, k))],
            out_specs=out_spec,
            out_shape=out_shape,
            scratch_shapes=scratch,
            compiler_params=cparams,
            cost_estimate=cost,
        )(margin_arr, x3)

    # Mean over the valid triplets (padded rows, if any, are discarded).
    return jnp.mean(losses[:B, 0])


# ------------------------------ reference ------------------------------------


def _softplus_b1_t1(x):
    return jnp.where(x > 1.0, x, jnp.log1p(jnp.exp(jnp.minimum(x, 1.0))))


def _reference_loss(batch, margin=1.0, use_softplus=False):
    x = batch.reshape(batch.shape[0], 3, -1).astype(jnp.float32)
    a, p, n = x[:, 0], x[:, 1], x[:, 2]
    d_pos = jnp.sqrt(jnp.sum((a - p) ** 2, axis=-1))
    d_neg = jnp.sqrt(jnp.sum((a - n) ** 2, axis=-1))
    diff = d_pos - d_neg
    if use_softplus:
        losses = _softplus_b1_t1(diff)
    else:
        losses = jnp.maximum(diff + margin, 0.0)
    return jnp.mean(losses)


if __name__ == "__main__":
    root = jax.random.PRNGKey(0)
    k1, k2, k3, k4 = jax.random.split(root, 4)

    # 1) Batch of 2 triplets, hidden=32: general path (D % 128 != 0), one chunk.
    b1 = jax.random.normal(k1, (2, 3, 32), dtype=jnp.float32)
    l1 = mean_triplet_batch_triplet_loss(b1, margin=1.0)
    r1 = _reference_loss(b1, margin=1.0)
    assert jnp.allclose(l1, r1, rtol=1e-5, atol=1e-5), (l1, r1)

    # 2) Multi-dim embedding: tiled reduction + gated tail mask (D=2000, 4 chunks).
    b2 = jax.random.normal(k2, (4, 3, 40, 50), dtype=jnp.float32)
    l2 = mean_triplet_batch_triplet_loss(b2, margin=0.5, block_d=512)
    r2 = _reference_loss(b2, margin=0.5)
    assert jnp.allclose(l2, r2, rtol=1e-5, atol=1e-5), (l2, r2)

    # 3) Fast per-role path (D=256), partial triplet block (B=11).
    b3 = jax.random.normal(k3, (11, 3, 256), dtype=jnp.float32)
    l3 = mean_triplet_batch_triplet_loss(b3, margin=1.0)
    r3 = _reference_loss(b3, margin=1.0)
    assert jnp.allclose(l3, r3, rtol=1e-5, atol=1e-5), (l3, r3)

    # 4) Fast path with a multi-chunk reduction and 2 parallel triplet blocks.
    b4 = jax.random.normal(k4, (16, 3, 512), dtype=jnp.float32)
    l4 = mean_triplet_batch_triplet_loss(b4, margin=1.0, block_d=128)
    r4 = _reference_loss(b4, margin=1.0)
    assert jnp.allclose(l4, r4, rtol=1e-5, atol=1e-5), (l4, r4)

    # 5) Softplus variant (SoftplusTripletLoss: beta=1, threshold=1, no margin).
    l5 = mean_triplet_batch_triplet_loss(b1, use_softplus=True)
    r5 = _reference_loss(b1, use_softplus=True)
    assert jnp.allclose(l5, r5, rtol=1e-5, atol=1e-5), (l5, r5)

    jax.block_until_ready((l1, l2, l3, l4, l5))
    print("KERNEL_OK")
</pallas_src>

<mosaic_0001>
module attributes {stable_mosaic.version = 11 : i64} {
  func.func @kernel(%arg0: i32, %arg1: i32, %arg2: memref<1xf32, #tpu.memory_space<smem>>, %arg3: memref<2x3x32xf32, #tpu.memory_space<vmem>>, %arg4: memref<2x1xf32, #tpu.memory_space<vmem>>, %arg5: memref<2x1xf32, #tpu.memory_space<vmem>>, %arg6: memref<2x1xf32, #tpu.memory_space<vmem>>) attributes {dimension_semantics = [#tpu.dimension_semantics<parallel>, #tpu.dimension_semantics<arbitrary>], iteration_bounds = array<i64: 1, 1>, scalar_prefetch = 0 : i64, scratch_operands = 2 : i64, tpu.core_type = #tpu.core_type<tc>, window_params = [{transform_indices = @transform_0, window_bounds = array<i64: 1>}, {transform_indices = @transform_1, window_bounds = array<i64: 2, 3, 32>}, {transform_indices = @transform_2, window_bounds = array<i64: 2, 1>}]} {
    %c0_i32 = arith.constant 0 : i32
    %0 = arith.cmpi eq, %arg1, %c0_i32 : i32
    %1 = arith.extui %0 : i1 to i32
    %c0_i32_0 = arith.constant 0 : i32
    %2 = arith.cmpi ne, %1, %c0_i32_0 : i32
    scf.if %2 {
      %cst_18 = arith.constant 0.000000e+00 : f32
      %26 = vector.broadcast %cst_18 : f32 to vector<2x1xf32>
      %c0_19 = arith.constant 0 : index
      %c0_20 = arith.constant 0 : index
      %27 = vector.load %arg5[%c0_19, %c0_20] : memref<2x1xf32, #tpu.memory_space<vmem>>, vector<2x1xf32>
      tpu.vector_store %arg5[%c0_19, %c0_20], %26 {strides = array<i32>} : memref<2x1xf32, #tpu.memory_space<vmem>>, vector<2x1xf32>,
      %cst_21 = arith.constant 0.000000e+00 : f32
      %28 = vector.broadcast %cst_21 : f32 to vector<2x1xf32>
      %c0_22 = arith.constant 0 : index
      %c0_23 = arith.constant 0 : index
      %29 = vector.load %arg6[%c0_22, %c0_23] : memref<2x1xf32, #tpu.memory_space<vmem>>, vector<2x1xf32>
      tpu.vector_store %arg6[%c0_22, %c0_23], %28 {strides = array<i32>} : memref<2x1xf32, #tpu.memory_space<vmem>>, vector<2x1xf32>,
    } else {
    }
    %c0 = arith.constant 0 : index
    %c0_1 = arith.constant 0 : index
    %c0_2 = arith.constant 0 : index
    %3 = vector.load %arg3[%c0, %c0_1, %c0_2] : memref<2x3x32xf32, #tpu.memory_space<vmem>>, vector<2x1x32xf32>
    %4 = vector.shape_cast %3 : vector<2x1x32xf32> to vector<2x32xf32>
    %c0_3 = arith.constant 0 : index
    %c1 = arith.constant 1 : index
    %c0_4 = arith.constant 0 : index
    %5 = vector.load %arg3[%c0_3, %c1, %c0_4] : memref<2x3x32xf32, #tpu.memory_space<vmem>>, vector<2x1x32xf32>
    %6 = vector.shape_cast %5 : vector<2x1x32xf32> to vector<2x32xf32>
    %c0_5 = arith.constant 0 : index
    %c2 = arith.constant 2 : index
    %c0_6 = arith.constant 0 : index
    %7 = vector.load %arg3[%c0_5, %c2, %c0_6] : memref<2x3x32xf32, #tpu.memory_space<vmem>>, vector<2x1x32xf32>
    %8 = vector.shape_cast %7 : vector<2x1x32xf32> to vector<2x32xf32>
    %9 = arith.subf %4, %6 : vector<2x32xf32>
    %10 = arith.subf %4, %8 : vector<2x32xf32>
    %c0_7 = arith.constant 0 : index
    %c0_8 = arith.constant 0 : index
    %11 = vector.load %arg5[%c0_7, %c0_8] : memref<2x1xf32, #tpu.memory_space<vmem>>, vector<2x1xf32>
    %12 = arith.mulf %9, %9 : vector<2x32xf32>
    %cst = arith.constant dense<0.000000e+00> : vector<2xf32>
    %13 = vector.multi_reduction <add>, %12, %cst [1] : vector<2x32xf32> to vector<2xf32>
    %14 = vector.shape_cast %13 : vector<2xf32> to vector<2x1xf32>
    %15 = arith.addf %11, %14 : vector<2x1xf32>
    %c0_9 = arith.constant 0 : index
    %c0_10 = arith.constant 0 : index
    %16 = vector.load %arg5[%c0_9, %c0_10] : memref<2x1xf32, #tpu.memory_space<vmem>>, vector<2x1xf32>
    tpu.vector_store %arg5[%c0_9, %c0_10], %15 {strides = array<i32>} : memref<2x1xf32, #tpu.memory_space<vmem>>, vector<2x1xf32>,
    %c0_11 = arith.constant 0 : index
    %c0_12 = arith.constant 0 : index
    %17 = vector.load %arg6[%c0_11, %c0_12] : memref<2x1xf32, #tpu.memory_space<vmem>>, vector<2x1xf32>
    %18 = arith.mulf %10, %10 : vector<2x32xf32>
    %cst_13 = arith.constant dense<0.000000e+00> : vector<2xf32>
    %19 = vector.multi_reduction <add>, %18, %cst_13 [1] : vector<2x32xf32> to vector<2xf32>
    %20 = vector.shape_cast %19 : vector<2xf32> to vector<2x1xf32>
    %21 = arith.addf %17, %20 : vector<2x1xf32>
    %c0_14 = arith.constant 0 : index
    %c0_15 = arith.constant 0 : index
    %22 = vector.load %arg6[%c0_14, %c0_15] : memref<2x1xf32, #tpu.memory_space<vmem>>, vector<2x1xf32>
    tpu.vector_store %arg6[%c0_14, %c0_15], %21 {strides = array<i32>} : memref<2x1xf32, #tpu.memory_space<vmem>>, vector<2x1xf32>,
    %c0_i32_16 = arith.constant 0 : i32
    %23 = arith.cmpi eq, %arg1, %c0_i32_16 : i32
    %24 = arith.extui %23 : i1 to i32
    %c0_i32_17 = arith.constant 0 : i32
    %25 = arith.cmpi ne, %24, %c0_i32_17 : i32
    scf.if %25 {
      %c0_18 = arith.constant 0 : index
      %c0_19 = arith.constant 0 : index
      %26 = vector.load %arg5[%c0_18, %c0_19] : memref<2x1xf32, #tpu.memory_space<vmem>>, vector<2x1xf32>
      %27 = math.sqrt %26 : vector<2x1xf32>
      %c0_20 = arith.constant 0 : index
      %c0_21 = arith.constant 0 : index
      %28 = vector.load %arg6[%c0_20, %c0_21] : memref<2x1xf32, #tpu.memory_space<vmem>>, vector<2x1xf32>
      %29 = math.sqrt %28 : vector<2x1xf32>
      %30 = arith.subf %27, %29 : vector<2x1xf32>
      %c0_22 = arith.constant 0 : index
      %31 = memref.load %arg2[%c0_22] : memref<1xf32, #tpu.memory_space<smem>>
      %32 = vector.broadcast %31 : f32 to vector<2x1xf32>
      %33 = arith.addf %30, %32 : vector<2x1xf32>
      %cst_23 = arith.constant 0.000000e+00 : f32
      %34 = vector.broadcast %cst_23 : f32 to vector<2x1xf32>
      %35 = arith.maximumf %33, %34 : vector<2x1xf32>
      %c0_24 = arith.constant 0 : index
      %c0_25 = arith.constant 0 : index
      %36 = vector.load %arg4[%c0_24, %c0_25] : memref<2x1xf32, #tpu.memory_space<vmem>>, vector<2x1xf32>
      tpu.vector_store %arg4[%c0_24, %c0_25], %35 {strides = array<i32>} : memref<2x1xf32, #tpu.memory_space<vmem>>, vector<2x1xf32>,
    } else {
    }
    return
  }
  func.func @transform_0(%arg0: i32, %arg1: i32) -> i32 {
    %c0_i32 = arith.constant 0 : i32
    %c0_i32_0 = arith.constant 0 : i32
    return %c0_i32 : i32
  }
  func.func @transform_1(%arg0: i32, %arg1: i32) -> (i32, i32, i32) {
    %c0_i32 = arith.constant 0 : i32
    %c0_i32_0 = arith.constant 0 : i32
    return %arg0, %c0_i32, %arg1 : i32, i32, i32
  }
  func.func @transform_2(%arg0: i32, %arg1: i32) -> (i32, i32) {
    %c0_i32 = arith.constant 0 : i32
    %c0_i32_0 = arith.constant 0 : i32
    return %arg0, %c0_i32 : i32, i32
  }
}

</mosaic_0001>

<bundles_post_ra>
// kernel: tpu_custom_call.1
= control target key start
LH: loop header
LB: loop body
LE: loop exit
PB: predicated region body
PF: predicated region fallthrough
CT: control target
= control target key end

     0   :  { %vm16_vm0 = vcmask 1024   ;;  %v92_v3 = vmov 0.0   ;;  %vm35_vm1 = vcmask 1041409   ;;  %vm38_vm2 = vcmask 254976   ;;  %s137_s1 = inlined_call_operand.vmem [shape: f32[2,3,32], index: 1, kind: input, shape index: {}]   ;;  %s138_s0 = inlined_call_operand.<no memory space> [shape: f32[1], index: 0, kind: input, shape index: {}]   ;;  %s139_s2 = inlined_call_operand.vmem [shape: f32[2,1], index: 2, kind: output, shape index: {}]  }
   0x1   :  { %v19_v0 = vld [vmem:[%s137_s1] sm:$0x1]  ;;  %v20_v1 = vld [vmem:[%s137_s1 + $0x4] sm:$0x1]  ;;  %v21_v2 = vld [vmem:[%s137_s1 + $0x1] sm:$0x1]  ;;  %v79_v39 = vstv %s138_s0 }
   0x2   :  { %17 = vst.msk [vmem:[#allocation2] sm:$0x3] %vm16_vm0, %v92_v3  ;;  %18 = vst.msk [vmem:[#allocation3] sm:$0x3] %vm16_vm0, %v92_v3  ;;  %v22_v4 = vld [vmem:[%s137_s1 + $0x5] sm:$0x1]  ;;  %v25_v5 = vsub.f32 %v19_v0, %v21_v2 }
   0x3   :  { %v23_v6 = vld [vmem:[%s137_s1 + $0x2] sm:$0x1]  ;;  %v24_v7 = vld [vmem:[%s137_s1 + $0x6] sm:$0x1]  ;;  %v26_v8 = vsub.f32 %v20_v1, %v22_v4 }
   0x4   :  { %v27_v9 = vsub.f32 %v19_v0, %v23_v6  ;;  %v28_v10 = vsub.f32 %v20_v1, %v24_v7  ;;  %v30_v11 = vmul.f32 %v25_v5, %v25_v5 }
   0x5   :  { %v31_v12 = vmul.f32 %v26_v8, %v26_v8 }
   0x6   :  { %v46_v13 = vmul.f32 %v27_v9, %v27_v9  ;;  %v47_v14 = vmul.f32 %v28_v10, %v28_v10 }
   0x7   :  { %v34_v15 = vrot.slane %v31_v12, 7 }
   0x8   :  { %v50_v16 = vrot.slane %v47_v14, 7 }
   0x9   :  { %v36_v17 = vsel %vm35_vm1, %v34_v15, %v30_v11  ;;  %v29_v21 = vld [vmem:[#allocation2] sm:$0x3]  ;;  %v45_v24 = vld [vmem:[#allocation3] sm:$0x3] }
   0xa   :  { %v51_v18 = vsel %vm35_vm1, %v50_v16, %v46_v13  ;;  %v39_v19 = vsel %vm38_vm2, %v36_v17, 0.0 }
   0xb   :  { %40 = vadd.xlane.f32.xlu0 %v39_v19  ;;  %v53_v20 = vsel %vm38_vm2, %v51_v18, 0.0 }
   0xf   :  { %54 = vadd.xlane.f32.xlu0 %v53_v20 }
  0x98   :  { %v41_v22 = vpop.xlane.xlu0 %40 }
  0x99   :  { %v42_v23 = vadd.f32 %v41_v22, %v29_v21 }
  0x9b   :  { %44 = vst.msk [vmem:[#allocation2] sm:$0x3] %vm16_vm0, %v42_v23 }
  0x9c   :  { %v55_v25 = vpop.xlane.xlu0 %54 }
  0x9d   :  { %v56_v26 = vadd.f32 %v55_v25, %v45_v24 }
  0x9f   :  { %57 = vst.msk [vmem:[#allocation3] sm:$0x3] %vm16_vm0, %v56_v26 }
  0xa2   :  { %v61_v27 = vld [vmem:[#allocation2] sm:$0x3] }
  0xa3   :  { %88 = vrsqrt.f32 %v61_v27  ;;  %vm64_vm3 = vcmp.eq.f32.partialorder %v61_v27, inf  ;;  %v67_v34 = vand.u32 2147483648, %v61_v27  ;;  %vm66_vm5 = vcmp.eq.f32.partialorder %v61_v27, 0.0 }
  0xa6   :  { %v69_v28 = vld [vmem:[#allocation3] sm:$0x3] }
  0xa7   :  { %90 = vrsqrt.f32 %v69_v28  ;;  %vm72_vm4 = vcmp.eq.f32.partialorder %v69_v28, inf  ;;  %v75_v35 = vand.u32 2147483648, %v69_v28  ;;  %vm74_vm6 = vcmp.eq.f32.partialorder %v69_v28, 0.0 }
  0xad   :  { %v89_v29 = vpop.eup %88 }
  0xae   :  { %v63_v30 = vmul.f32 %v89_v29, %v61_v27 }
  0xb0   :  { %v65_v32 = vsel %vm64_vm3, %v61_v27, %v63_v30 }
  0xb1   :  { %v91_v31 = vpop.eup %90  ;;  %v68_v37 = vsel %vm66_vm5, %v67_v34, %v65_v32 }
  0xb2   :  { %v71_v33 = vmul.f32 %v91_v31, %v69_v28 }
  0xb4   :  { %v73_v36 = vsel %vm72_vm4, %v69_v28, %v71_v33 }
  0xb5   :  { %v76_v38 = vsel %vm74_vm6, %v75_v35, %v73_v36 }
  0xb6   :  { %v77_v40 = vsub.f32 %v68_v37, %v76_v38 }
  0xb8   :  { %v80_v41 = vadd.f32 %v79_v39, %v77_v40 }
  0xba   :  { %v81_v42 = vmax.f32 %v80_v41, 0.0 }
  0xbc   :  { %82 = vst.msk [vmem:[%s139_s2] sm:$0x3] %vm16_vm0, %v81_v42 }

</bundles_post_ra>
